<compile_context>
chip_gen: v7x
topology: tpu7x:2x2x1
jax: 0.10.0
libtpu: 0.0.40
codegen_flags: <defaults>
</compile_context>

<pallas_src>
import functools

import jax
import jax.numpy as jnp
from jax.experimental import pallas as pl
from jax.experimental.pallas import tpu as pltpu


def _gcn_kernel(adj_ref, xw_ref, out_ref, *, tk, xw_resident):
    """out[i-block] = sum_k adj[i-block, k-block] @ xw[k-block].

    Grid = (N // tm, N // tk); axis 0 tiles output rows ("parallel"),
    axis 1 reduces over adjacency columns ("arbitrary").  The output block
    index is constant in k, so out_ref stays resident and acts as the f32
    accumulator (init at k == 0).
    """
    k = pl.program_id(1)

    @pl.when(k == 0)
    def _():
        out_ref[...] = jnp.zeros_like(out_ref)

    if xw_resident:
        # Full xw lives in VMEM (single DMA); slice the rows for this k-step.
        xw = xw_ref[pl.ds(pl.multiple_of(k * tk, 128), tk), :]
    else:
        xw = xw_ref[...]

    out_ref[...] += jnp.dot(adj_ref[...], xw, preferred_element_type=jnp.float32)


def _round_up(v, m):
    return (v + m - 1) // m * m


def _pick_tk(n, cap):
    """Largest 128-multiple dividing n and <= cap (n is a 128-multiple)."""
    cap = max(128, min(cap, n))
    cands = [t for t in range(128, cap + 1, 128) if n % t == 0]
    return max(cands) if cands else 128


def _pick_tm(n, cap):
    """Row tile: largest 128-multiple dividing n, preferring an even number of
    row steps (balanced across v7x's 2 TensorCores) with >= 2 steps per core."""
    cap = max(128, min(cap, n))
    cands = [t for t in range(128, cap + 1, 128) if n % t == 0]
    even4 = [t for t in cands if (n // t) % 2 == 0 and n // t >= 4]
    even2 = [t for t in cands if (n // t) % 2 == 0]
    for pool in (even4, even2, cands):
        if pool:
            return max(pool)
    return 128


@functools.partial(jax.jit, static_argnames=("tm_cap", "tk_cap"))
def gcn_conv(adj, x, weight, *, tm_cap=512, tk_cap=4096):
    """GCNConv forward: adj @ x @ weight (bias unused, matching reference)."""
    n, c_in = x.shape
    c_out = weight.shape[1]
    assert adj.shape == (n, n)
    assert weight.shape[0] == c_in

    # Pad node count to a multiple of 128 (zero rows/cols are exact: padded
    # adj columns hit zero xw rows; padded output rows are sliced off).
    n_pad = _round_up(n, 128)
    if n_pad != n:
        adj = jnp.pad(adj, ((0, n_pad - n), (0, n_pad - n)))
        x = jnp.pad(x, ((0, n_pad - n), (0, 0)))

    # Lane-dense output features (zero-padded weight columns).
    c_out_pad = _round_up(c_out, 128)
    w_pad = jnp.pad(weight, ((0, 0), (0, c_out_pad - c_out))).astype(jnp.float32)

    # Tiny projection done once by XLA; the kernel then only streams adj.
    xw = x.astype(jnp.float32) @ w_pad                      # (n_pad, c_out_pad) f32
    if adj.dtype == jnp.bfloat16:
        xw = xw.astype(jnp.bfloat16)                        # bf16 MXU path if adj is bf16

    # Tile selection: long reduction tiles to amortize per-step overhead; row
    # tiles sized so the parallel axis has an even step count (v7x megacore).
    tk = _pick_tk(n_pad, tk_cap)
    tm = _pick_tm(n_pad, tm_cap)
    grid = (n_pad // tm, n_pad // tk)

    # Keep xw fully VMEM-resident (single DMA over the whole kernel) when it
    # fits a small budget; otherwise stream it per reduction step.
    xw_resident = 2 * n_pad * c_out_pad * xw.dtype.itemsize <= 8 * 1024 * 1024
    if xw_resident:
        xw_spec = pl.BlockSpec((n_pad, c_out_pad), lambda i, k: (0, 0))
    else:
        xw_spec = pl.BlockSpec((tk, c_out_pad), lambda i, k: (k, 0))

    adj_spec = pl.BlockSpec((tm, tk), lambda i, k: (i, k))
    out_spec = pl.BlockSpec((tm, c_out_pad), lambda i, k: (i, 0))

    # VMEM sized from the actual (double-buffered) working set + margin.
    vmem_need = (
        2 * tm * tk * adj.dtype.itemsize
        + 2 * (n_pad if xw_resident else tk) * c_out_pad * xw.dtype.itemsize
        + 2 * tm * c_out_pad * 4
    )
    vmem_limit = int(max(vmem_need + (4 << 20), 16 << 20))

    kernel = functools.partial(_gcn_kernel, tk=tk, xw_resident=xw_resident)

    out = pl.pallas_call(
        kernel,
        out_shape=jax.ShapeDtypeStruct((n_pad, c_out_pad), jnp.float32),
        grid_spec=pltpu.PrefetchScalarGridSpec(
            num_scalar_prefetch=0,
            grid=grid,
            in_specs=[adj_spec, xw_spec],
            out_specs=out_spec,
        ),
        compiler_params=pltpu.CompilerParams(
            dimension_semantics=("parallel", "arbitrary"),
            vmem_limit_bytes=vmem_limit,
        ),
    )(adj, xw)

    return out[:n, :c_out]


def glorot(key, shape, dtype=jnp.float32):
    fan_in, fan_out = shape
    limit = jnp.sqrt(6.0 / (fan_in + fan_out))
    return jax.random.uniform(key, shape, dtype, minval=-limit, maxval=limit)


if __name__ == "__main__":
    # Small shapes consistent with GCNConv: N nodes, in/out feature dims.
    N, C_IN, C_OUT = 512, 64, 112

    key = jax.random.PRNGKey(0)
    k_adj, k_x, k_w = jax.random.split(key, 3)

    # Dense row-normalized adjacency (synthetic), kept in f32 like PyTorch.
    adj = jax.random.uniform(k_adj, (N, N), jnp.float32)
    adj = (adj > 0.9).astype(jnp.float32)
    deg = jnp.clip(adj.sum(axis=1, keepdims=True), 1.0, None)
    adj = adj / deg

    x = jax.random.normal(k_x, (N, C_IN), jnp.float32)

    # Deterministic parameter init matching reset_parameters():
    weight = glorot(k_w, (C_IN, C_OUT))
    bias = jnp.zeros((C_OUT,), jnp.float32)  # created but unused in forward

    out = gcn_conv(adj, x, weight)
    jax.block_until_ready(out)

    # f32 reference matching the PyTorch forward ((adj @ x) @ W).  The kernel
    # computes adj @ (x @ W) in f32, so only associativity-level rounding
    # differences remain.
    ref = (adj @ x) @ weight
    assert out.shape == (N, C_OUT)
    assert jnp.allclose(out, ref, atol=1e-2, rtol=1e-2), float(
        jnp.max(jnp.abs(out - ref))
    )

    print("KERNEL_OK")
</pallas_src>

<mosaic_0001>
module attributes {stable_mosaic.version = 11 : i64} {
  func.func @_gcn_kernel(%arg0: i32, %arg1: i32, %arg2: memref<128x512xf32, #tpu.memory_space<vmem>>, %arg3: memref<512x128xf32, #tpu.memory_space<vmem>>, %arg4: memref<128x128xf32, #tpu.memory_space<vmem>>) attributes {dimension_semantics = [#tpu.dimension_semantics<parallel>, #tpu.dimension_semantics<arbitrary>], iteration_bounds = array<i64: 4, 1>, scalar_prefetch = 0 : i64, scratch_operands = 0 : i64, tpu.core_type = #tpu.core_type<tc>, window_params = [{transform_indices = @transform_0, window_bounds = array<i64: 128, 512>}, {pipeline_mode = #tpu.pipeline_mode<synchronous>, transform_indices = @transform_1, window_bounds = array<i64: 512, 128>}, {transform_indices = @transform_2, window_bounds = array<i64: 128, 128>}]} {
    %c0_i32 = arith.constant 0 : i32
    %0 = arith.cmpi eq, %arg1, %c0_i32 : i32
    %1 = arith.extui %0 : i1 to i32
    %c0_i32_0 = arith.constant 0 : i32
    %2 = arith.cmpi ne, %1, %c0_i32_0 : i32
    scf.if %2 {
      %cst_7 = arith.constant 0.000000e+00 : f32
      %12 = vector.broadcast %cst_7 : f32 to vector<128x128xf32>
      %c0_8 = arith.constant 0 : index
      %c0_9 = arith.constant 0 : index
      %13 = vector.load %arg4[%c0_8, %c0_9] : memref<128x128xf32, #tpu.memory_space<vmem>>, vector<128x128xf32>
      tpu.vector_store %arg4[%c0_8, %c0_9], %12 {strides = array<i32>} : memref<128x128xf32, #tpu.memory_space<vmem>>, vector<128x128xf32>,
    } else {
    }
    %c512_i32 = arith.constant 512 : i32
    %3 = arith.muli %arg1, %c512_i32 : i32
    %4 = tpu.assume_multiple %3, 128 : i32
    %5 = arith.index_cast %4 : i32 to index
    %c0 = arith.constant 0 : index
    %6 = vector.load %arg3[%5, %c0] : memref<512x128xf32, #tpu.memory_space<vmem>>, vector<512x128xf32>
    %c0_1 = arith.constant 0 : index
    %c0_2 = arith.constant 0 : index
    %7 = vector.load %arg4[%c0_1, %c0_2] : memref<128x128xf32, #tpu.memory_space<vmem>>, vector<128x128xf32>
    %c0_3 = arith.constant 0 : index
    %c0_4 = arith.constant 0 : index
    %8 = vector.load %arg2[%c0_3, %c0_4] : memref<128x512xf32, #tpu.memory_space<vmem>>, vector<128x512xf32>
    %cst = arith.constant dense<0.000000e+00> : vector<128x128xf32>
    %9 = tpu.matmul %8, %6, %cst {dimension_numbers = #tpu.dot_dimension_numbers<[1], [0], [0], [1], [0, 0, 1, 1], [], []>} : vector<128x512xf32>, vector<512x128xf32>, vector<128x128xf32> -> vector<128x128xf32>
    %10 = arith.addf %7, %9 : vector<128x128xf32>
    %c0_5 = arith.constant 0 : index
    %c0_6 = arith.constant 0 : index
    %11 = vector.load %arg4[%c0_5, %c0_6] : memref<128x128xf32, #tpu.memory_space<vmem>>, vector<128x128xf32>
    tpu.vector_store %arg4[%c0_5, %c0_6], %10 {strides = array<i32>} : memref<128x128xf32, #tpu.memory_space<vmem>>, vector<128x128xf32>,
    return
  }
  func.func @transform_0(%arg0: i32, %arg1: i32) -> (i32, i32) {
    %c0_i32 = arith.constant 0 : i32
    return %arg0, %arg1 : i32, i32
  }
  func.func @transform_1(%arg0: i32, %arg1: i32) -> (i32, i32) {
    %c0_i32 = arith.constant 0 : i32
    %c0_i32_0 = arith.constant 0 : i32
    %c0_i32_1 = arith.constant 0 : i32
    return %c0_i32, %c0_i32_0 : i32, i32
  }
  func.func @transform_2(%arg0: i32, %arg1: i32) -> (i32, i32) {
    %c0_i32 = arith.constant 0 : i32
    %c0_i32_0 = arith.constant 0 : i32
    return %arg0, %c0_i32 : i32, i32
  }
}

</mosaic_0001>

<bundles_post_ra>
// kernel: gcn_conv.1
= control target key start
LH: loop header
LB: loop body
LE: loop exit
PB: predicated region body
PF: predicated region fallthrough
CT: control target
= control target key end

     0   :  { %7 = vsyncpa [#allocation3], 0  ;;  %s1550_s0 = inlined_call_operand.hbm [shape: f32[512,512], index: 0, kind: input, shape index: {}]   ;;  %s1551_s1 = inlined_call_operand.vmem [shape: f32[512,128], index: 1, kind: input, shape index: {}]   ;;  %s1552_s2 = inlined_call_operand.vmem [shape: f32[512,128], index: 2, kind: output, shape index: {}]  }
   0x1   :  { %9 = vsyncpa [#allocation3 + $0x1], 0  ;;  %s1151_s9 = smov 0   ;;  %s1153_s10 = smov 0  }
   0x2   :  { %s1155_s11 = smov 0   ;;  %s1157_s12 = smov 0  }
   0x3   :  { %s1159_s13 = smov 0   ;;  %s1161_s14 = smov 0  }
   0x4 LB: > { %s753_s15 = sadd.s32 4294967295, %s1131_s14   ;;  %s27_s16 = sadd.s32 1, %s1127_s13  ;;  %s1131_s14 = sphi %s1161_s14, %s15_s14   ;;  %s1127_s13 = sphi %s1159_s13, %s1560_s13   ;;  %s1123_s12 = sphi %s1157_s12, %s1559_s12   ;;  %s1119_s11 = sphi %s1155_s11, %s1558_s11   ;;  %s1115_s10 = sphi %s1153_s10, %s1557_s10   ;;  %s1111_s9 = sphi %s1151_s9, %s1556_s9  }
   0x5   : > { %p29_p0 = scmp.ge.s32.totalorder %s27_s16, 4  ;;  %s36_s17 = sadd.s32 1, %s1119_s11 }
   0x6   : > { %p43_p1 = scmp.ne.s32.totalorder %s1119_s11, %s1115_s10  ;;  %p44_p2 = scmp.eq.s32.totalorder %s1131_s14, 0 }
   0x7   : > { %s1562_s16 = smov (%p29_p0, %s27_s16), 0  ;;  %p49_p4 = scmp.ne.s32.totalorder %s1115_s10, %s1111_s9 }
   0x8   : > { %p1187_p3 = por %p44_p2, %p43_p1  ;;  %s31_s19 = ssub.s32 %s1127_s13, %s1562_s16 }
   0x9   : > { %p50_p5 = scmp.eq.s32.totalorder %s753_s15, 0  ;;  %p34_p6 = scmp.eq.s32.totalorder %s31_s19, 0 }
   0xa   : > { %p999_p8 = scmp.lt.s32.totalorder %s1131_s14, 4  ;;  %s123_s22 = sand.u32 1, %s1119_s11  }
   0xb   : > { %p1194_p7 = por %p50_p5, %p49_p4  ;;  %s768_s23 = sshll.u32 %s1127_s13, 13 }
   0xc   : > { %s1200_s21 = scalar_select %p34_p6, %s1119_s11, %s36_s17  }
   0xd   : > { %s757_s24 = sshll.u32 %s123_s22, 9  ;;  %s1207_s27 = scalar_lea.hbm %s1550_s0, %s768_s23 }
   0xe   : > { %s127_s28 = scalar_lea.vmem [#allocation2], %s757_s24  ;;  %p1211_p9 = pnand %p999_p8, %p1187_p3 }
   0xf   : > { %s137_s29 = sshll.u32 %s127_s28, 4  ;;  %s1217_s3 = scalar_lea.sflag [#allocation3], %s123_s22  ;;  %s1215_s29 = int_to_ptr.vmem [resolvable:$true] %s137_s29 }
  0x10   : > { %s1051_s4 = scalar_lea.hbm %s1207_s27, 8192  ;;  %p1053_p11 = pneg %p1211_p9 }
  0x11   : > { %p1052_p10 = scmp.ne.s32.totalorder %s1207_s27, %s1051_s4  ;;  %s1056_s7 = scalar_lea.hbm %s1550_s0, 32768 }
  0x12   : > { %p1057_p0 = scmp.lt.u32.totalorder %s1207_s27, %s1550_s0  ;;  %p1058_p1 = scmp.lt.u32.totalorder %s1056_s7, %s1051_s4 }
  0x13   : > { %p1054_p12 = pnand %p1053_p11, %p1052_p10  ;;  %p1060_p3 = scmp.lt.u32.totalorder %s1051_s4, %s1207_s27 }
  0x14   : > { %p1059_p2 = por %p1058_p1, %p1057_p0 }
  0x15   : > { %p1055_p13 = pneg %p1054_p12 }
  0x16   : > { %p1061_p4 = por %p1060_p3, %p1059_p2 }
  0x18   : > { %p1062_p5 = pnand %p1061_p4, %p1055_p13 }
  0x1a   : > { %1065 = shalt.err (!%p1062_p5)
}
  0x1b   : > { %s1066_s15 = scalar_lea.vmem %s1215_s29, 8192  ;;  %s1133_s17 = smov [#allocation2]  }
  0x1c   : > { %p1067_p6 = scmp.ne.s32.totalorder %s1215_s29, %s1066_s15  ;;  %s1071_s18 = sshll.u32 %s1133_s17, 4  ;;  %s1072_s18 = int_to_ptr.vmem [resolvable:$false] %s1071_s18 }
  0x1d   : > { %s1073_s19 = scalar_lea.vmem %s1072_s18, 16384  ;;  %p1074_p12 = scmp.lt.s32.totalorder %s1215_s29, %s1072_s18 }
  0x1e   : > { %p1069_p8 = pnand %p1067_p6, %p1053_p11  ;;  %p1075_p0 = scmp.lt.s32.totalorder %s1073_s19, %s1066_s15 }
  0x20   : > { %p1070_p10 = pneg %p1069_p8  ;;  %p1076_p1 = por %p1075_p0, %p1074_p12 }
  0x22   : > { %p1077_p2 = pnand %p1076_p1, %p1070_p10 }
  0x24   : > { %1080 = shalt.err (!%p1077_p2)
}
  0x25   : > { %s1134_s22 = smov 512   ;;  %s1135_s23 = smov 32  }
  0x26   : > { %998 = dma.hbm_to_vmem [thread:$0]  (!%p1211_p9), %s1207_s27, 8192, %s1215_s29, %s1217_s3, %s1134_s22, %s1134_s22, %s1135_s23  }
  0x27   : > { %p761_p11 = scmp.ge.s32.totalorder %s1131_s14, 1  ;;  %p145_p13 = scmp.lt.s32.totalorder %s1131_s14, 5 }
  0x29   : > { %p146_p3 = pnand %p761_p11, %p145_p13 }
  0x2a   : > { %s151_s24 = sand.u32 (!%p146_p3), 1, %s1115_s10  }
  0x2b   : > { %149 = sbr.rel (%p146_p3) target bundleno = 366 (0x16e), region = 28  ;;  %s762_s25 = sshll.u32 (!%p146_p3), %s151_s24, 9 }
  0x2c   : > { %s152_s26 = scalar_lea.sflag (!%p146_p3), [#allocation3], %s151_s24  ;;  %s1248_s28 = scalar_lea.vmem (!%p146_p3), [#allocation2], %s762_s25 }
  0x32   : > { %1106 = dma.done.wait (%p1194_p7), %s152_s26, 8192  }
  0x33   : > { %1108 = vsyncadd (%p1194_p7), %s152_s26, 4294959104  ;;  %v222_v0 = vld [vmem:[%s1551_s1 + $0x80] sm:$0xff]  ;;  %v223_v1 = vld [vmem:[%s1551_s1 + $0x88] sm:$0xff]  ;;  %s763_s8 = sshll.u32 %s1123_s12, 4 }
  0x34   : > { %v254_v2 = vld [vmem:[%s1551_s1 + $0x180] sm:$0xff]  ;;  %v929_v3 = vpack.c.bf16 %v223_v1, %v222_v0  ;;  %v255_v4 = vld [vmem:[%s1551_s1 + $0x188] sm:$0xff]  ;;  %v224_v11 = vld [vmem:[%s1551_s1 + $0x90] sm:$0xff]  ;;  %p179_p7 = scmp.lt.s32.totalorder %s763_s8, 63 }
  0x35   : > { %v206_v5 = vld [vmem:[%s1551_s1] sm:$0xff]  ;;  %v207_v6 = vld [vmem:[%s1551_s1 + $0x8] sm:$0xff]  ;;  %v961_v7 = vpack.c.bf16 %v255_v4, %v254_v2  ;;  %v225_v13 = vld [vmem:[%s1551_s1 + $0x98] sm:$0xff] }
  0x36   : > { %v931_v8 = vpack.c.bf16 %v207_v6, %v206_v5  ;;  %v238_v9 = vld [vmem:[%s1551_s1 + $0x100] sm:$0xff]  ;;  %v239_v10 = vld [vmem:[%s1551_s1 + $0x108] sm:$0xff]  ;;  %930 = vmatprep.subr.bf16.mxu0 %v929_v3  ;;  %v256_v14 = vld [vmem:[%s1551_s1 + $0x190] sm:$0xff]  ;;  %v933_v16 = vpack.c.bf16 %v225_v13, %v224_v11  ;;  %s1564_s8 = smov (!%p179_p7, %s763_s8), 63 }
  0x37   : > { %v963_v12 = vpack.c.bf16 %v239_v10, %v238_v9  ;;  %v257_v15 = vld [vmem:[%s1551_s1 + $0x198] sm:$0xff]  ;;  %962 = vmatprep.subr.bf16.mxu1 %v961_v7  ;;  %v208_v18 = vld [vmem:[%s1551_s1 + $0x10] sm:$0xff]  ;;  %v226_v23 = vld [vmem:[%s1551_s1 + $0xa0] sm:$0xff]  ;;  %s764_s20 = sshll.u32 %s1564_s8, 3 }
  0x38   : > { %932 = vmatpush3.bf16.msra.mxu0 %v931_v8  ;;  %v965_v17 = vpack.c.bf16 %v257_v15, %v256_v14  ;;  %v209_v19 = vld [vmem:[%s1551_s1 + $0x18] sm:$0xff]  ;;  %v240_v20 = vld [vmem:[%s1551_s1 + $0x110] sm:$0xff]  ;;  %v227_v24 = vld [vmem:[%s1551_s1 + $0xa8] sm:$0xff] }
  0x39   : > { %964 = vmatpush3.bf16.msra.mxu1 %v963_v12  ;;  %v935_v21 = vpack.c.bf16 %v209_v19, %v208_v18  ;;  %v241_v22 = vld [vmem:[%s1551_s1 + $0x118] sm:$0xff]  ;;  %934 = vmatprep.subr.bf16.mxu0 %v933_v16  ;;  %v937_v26 = vpack.c.bf16 %v227_v24, %v226_v23  ;;  %v258_v27 = vld [vmem:[%s1551_s1 + $0x1a0] sm:$0xff]  ;;  %v259_v28 = vld [vmem:[%s1551_s1 + $0x1a8] sm:$0xff] }
  0x3a   : > { %966 = vmatprep.subr.bf16.mxu1 %v965_v17  ;;  %v967_v25 = vpack.c.bf16 %v241_v22, %v240_v20  ;;  %v210_v29 = vld [vmem:[%s1551_s1 + $0x20] sm:$0xff]  ;;  %v969_v30 = vpack.c.bf16 %v259_v28, %v258_v27  ;;  %v211_v31 = vld [vmem:[%s1551_s1 + $0x28] sm:$0xff]  ;;  %v228_v35 = vld [vmem:[%s1551_s1 + $0xb0] sm:$0xff] }
  0x3b   : > { %v242_v32 = vld [vmem:[%s1551_s1 + $0x120] sm:$0xff]  ;;  %v243_v33 = vld [vmem:[%s1551_s1 + $0x128] sm:$0xff]  ;;  %v939_v34 = vpack.c.bf16 %v211_v31, %v210_v29  ;;  %v229_v36 = vld [vmem:[%s1551_s1 + $0xb8] sm:$0xff] }
  0x3c   : > { %936 = vmatpush3.bf16.msra.mxu0 %v935_v21  ;;  %v260_v37 = vld [vmem:[%s1551_s1 + $0x1b0] sm:$0xff]  ;;  %v971_v38 = vpack.c.bf16 %v243_v33, %v242_v32  ;;  %v941_v39 = vpack.c.bf16 %v229_v36, %v228_v35  ;;  %v261_v40 = vld [vmem:[%s1551_s1 + $0x1b8] sm:$0xff]  ;;  %v230_v46 = vld [vmem:[%s1551_s1 + $0xc0] sm:$0xff] }
  0x3d   : > { %968 = vmatpush3.bf16.msra.mxu1 %v967_v25  ;;  %938 = vmatprep.subr.bf16.mxu0 %v937_v26  ;;  %v212_v41 = vld [vmem:[%s1551_s1 + $0x30] sm:$0xff]  ;;  %v213_v42 = vld [vmem:[%s1551_s1 + $0x38] sm:$0xff]  ;;  %v973_v43 = vpack.c.bf16 %v261_v40, %v260_v37  ;;  %v231_v47 = vld [vmem:[%s1551_s1 + $0xc8] sm:$0xff] }
  0x3e   : > { %970 = vmatprep.subr.bf16.mxu1 %v969_v30  ;;  %v244_v44 = vld [vmem:[%s1551_s1 + $0x130] sm:$0xff]  ;;  %v245_v45 = vld [vmem:[%s1551_s1 + $0x138] sm:$0xff]  ;;  %v262_v48 = vld [vmem:[%s1551_s1 + $0x1c0] sm:$0xff]  ;;  %v943_v50 = vpack.c.bf16 %v213_v42, %v212_v41  ;;  %v945_v52 = vpack.c.bf16 %v231_v47, %v230_v46 }
  0x3f   : > { %v263_v49 = vld [vmem:[%s1551_s1 + $0x1c8] sm:$0xff]  ;;  %v975_v51 = vpack.c.bf16 %v245_v45, %v244_v44  ;;  %v214_v53 = vld [vmem:[%s1551_s1 + $0x40] sm:$0xff]  ;;  %v232_v58 = vld [vmem:[%s1551_s1 + $0xd0] sm:$0xff] }
  0x40   : > { %940 = vmatpush3.bf16.msra.mxu0 %v939_v34  ;;  %v215_v54 = vld [vmem:[%s1551_s1 + $0x48] sm:$0xff]  ;;  %v246_v55 = vld [vmem:[%s1551_s1 + $0x140] sm:$0xff]  ;;  %v977_v56 = vpack.c.bf16 %v263_v49, %v262_v48  ;;  %v233_v59 = vld [vmem:[%s1551_s1 + $0xd8] sm:$0xff] }
  0x41   : > { %972 = vmatpush3.bf16.msra.mxu1 %v971_v38  ;;  %942 = vmatprep.subr.bf16.mxu0 %v941_v39  ;;  %v247_v57 = vld [vmem:[%s1551_s1 + $0x148] sm:$0xff]  ;;  %v264_v60 = vld [vmem:[%s1551_s1 + $0x1d0] sm:$0xff]  ;;  %v265_v61 = vld [vmem:[%s1551_s1 + $0x1d8] sm:$0xff]  ;;  %v947_v62 = vpack.c.bf16 %v215_v54, %v214_v53  ;;  %v949_v0 = vpack.c.bf16 %v233_v59, %v232_v58 }
  0x42   : > { %974 = vmatprep.subr.bf16.mxu1 %v973_v43  ;;  %v979_v63 = vpack.c.bf16 %v247_v57, %v246_v55  ;;  %v216_v1 = vld [vmem:[%s1551_s1 + $0x50] sm:$0xff]  ;;  %v217_v2 = vld [vmem:[%s1551_s1 + $0x58] sm:$0xff]  ;;  %v981_v4 = vpack.c.bf16 %v265_v61, %v264_v60  ;;  %v234_v6 = vld [vmem:[%s1551_s1 + $0xe0] sm:$0xff] }
  0x43   : > { %v248_v3 = vld [vmem:[%s1551_s1 + $0x150] sm:$0xff]  ;;  %v249_v5 = vld [vmem:[%s1551_s1 + $0x158] sm:$0xff]  ;;  %v235_v7 = vld [vmem:[%s1551_s1 + $0xe8] sm:$0xff]  ;;  %v951_v10 = vpack.c.bf16 %v217_v2, %v216_v1 }
  0x44   : > { %944 = vmatpush3.bf16.msra.mxu0 %v943_v50  ;;  %v266_v8 = vld [vmem:[%s1551_s1 + $0x1e0] sm:$0xff]  ;;  %v267_v9 = vld [vmem:[%s1551_s1 + $0x1e8] sm:$0xff]  ;;  %v983_v13 = vpack.c.bf16 %v249_v5, %v248_v3  ;;  %v953_v14 = vpack.c.bf16 %v235_v7, %v234_v6  ;;  %v289_v17 = vld [vmem:[%s1248_s28 + $0x18] sm:$0xff] }
  0x45   : > { %976 = vmatpush3.bf16.msra.mxu1 %v975_v51  ;;  %946 = vmatprep.subr.bf16.mxu0 %v945_v52  ;;  %v218_v11 = vld [vmem:[%s1551_s1 + $0x60] sm:$0xff]  ;;  %v219_v12 = vld [vmem:[%s1551_s1 + $0x68] sm:$0xff]  ;;  %v985_v18 = vpack.c.bf16 %v267_v9, %v266_v8  ;;  %v236_v20 = vld [vmem:[%s1551_s1 + $0xf0] sm:$0xff] }
  0x46   : > { %978 = vmatprep.subr.bf16.mxu1 %v977_v56  ;;  %v250_v15 = vld [vmem:[%s1551_s1 + $0x160] sm:$0xff]  ;;  %v287_v16 = vld [vmem:[%s1248_s28 + $0x8] sm:$0xff]  ;;  %v237_v21 = vld [vmem:[%s1551_s1 + $0xf8] sm:$0xff]  ;;  %559 = vmatprep.mubr.f32.mxu1 %v289_v17  ;;  %v955_v24 = vpack.c.bf16 %v219_v12, %v218_v11 }
  0x47   : > { %v251_v19 = vld [vmem:[%s1551_s1 + $0x168] sm:$0xff]  ;;  %414 = vmatprep.mubr.f32.mxu0 %v287_v16  ;;  %v268_v22 = vld [vmem:[%s1551_s1 + $0x1f0] sm:$0xff]  ;;  %v269_v23 = vld [vmem:[%s1551_s1 + $0x1f8] sm:$0xff]  ;;  %v957_v26 = vpack.c.bf16 %v237_v21, %v236_v20 }
  0x48   : > { %948 = vmatpush3.bf16.msra.mxu0 %v947_v62  ;;  %v987_v25 = vpack.c.bf16 %v251_v19, %v250_v15  ;;  %v220_v27 = vld [vmem:[%s1551_s1 + $0x70] sm:$0xff]  ;;  %v221_v28 = vld [vmem:[%s1551_s1 + $0x78] sm:$0xff]  ;;  %v989_v29 = vpack.c.bf16 %v269_v23, %v268_v22  ;;  %v286_v34 = vld [vmem:[%s1248_s28] sm:$0xff] }
  0x49   : > { %980 = vmatpush3.bf16.msra.mxu1 %v979_v63  ;;  %950 = vmatprep.subr.bf16.mxu0 %v949_v0  ;;  %v252_v30 = vld [vmem:[%s1551_s1 + $0x170] sm:$0xff]  ;;  %v253_v31 = vld [vmem:[%s1551_s1 + $0x178] sm:$0xff]  ;;  %v959_v32 = vpack.c.bf16 %v221_v28, %v220_v27  ;;  %v291_v36 = vld [vmem:[%s1248_s28 + $0x28] sm:$0xff] }
  0x4a   : > { %982 = vmatprep.subr.bf16.mxu1 %v981_v4  ;;  %v991_v33 = vpack.c.bf16 %v253_v31, %v252_v30  ;;  %v288_v35 = vld [vmem:[%s1248_s28 + $0x10] sm:$0xff]  ;;  %v293_v37 = vld [vmem:[%s1248_s28 + $0x38] sm:$0xff]  ;;  %v290_v38 = vld [vmem:[%s1248_s28 + $0x20] sm:$0xff] }
  0x4b   : > { %v292_v39 = vld [vmem:[%s1248_s28 + $0x30] sm:$0xff]  ;;  %v295_v40 = vld [vmem:[%s1248_s28 + $0x48] sm:$0xff]  ;;  %v297_v41 = vld [vmem:[%s1248_s28 + $0x58] sm:$0xff] }
  0x4c   : > { %952 = vmatpush3.bf16.msra.mxu0 %v951_v10  ;;  %v294_v42 = vld [vmem:[%s1248_s28 + $0x40] sm:$0xff]  ;;  %v296_v43 = vld [vmem:[%s1248_s28 + $0x50] sm:$0xff]  ;;  %v299_v44 = vld [vmem:[%s1248_s28 + $0x68] sm:$0xff] }
  0x4d   : > { %984 = vmatpush3.bf16.msra.mxu1 %v983_v13  ;;  %954 = vmatprep.subr.bf16.mxu0 %v953_v14  ;;  %v301_v45 = vld [vmem:[%s1248_s28 + $0x78] sm:$0xff]  ;;  %v298_v46 = vld [vmem:[%s1248_s28 + $0x60] sm:$0xff]  ;;  %v300_v47 = vld [vmem:[%s1248_s28 + $0x70] sm:$0xff] }
  0x4e   : > { %986 = vmatprep.subr.bf16.mxu1 %v985_v18  ;;  %v303_v48 = vld [vmem:[%s1248_s28 + $0x88] sm:$0xff]  ;;  %v305_v49 = vld [vmem:[%s1248_s28 + $0x98] sm:$0xff]  ;;  %v302_v50 = vld [vmem:[%s1248_s28 + $0x80] sm:$0xff] }
  0x4f   : > { %v304_v51 = vld [vmem:[%s1248_s28 + $0x90] sm:$0xff]  ;;  %v307_v52 = vld [vmem:[%s1248_s28 + $0xa8] sm:$0xff]  ;;  %v309_v53 = vld [vmem:[%s1248_s28 + $0xb8] sm:$0xff] }
  0x50   : > { %956 = vmatpush3.bf16.msra.mxu0 %v955_v24  ;;  %v306_v54 = vld [vmem:[%s1248_s28 + $0xa0] sm:$0xff]  ;;  %v308_v55 = vld [vmem:[%s1248_s28 + $0xb0] sm:$0xff]  ;;  %v311_v56 = vld [vmem:[%s1248_s28 + $0xc8] sm:$0xff] }
  0x51   : > { %988 = vmatpush3.bf16.msra.mxu1 %v987_v25  ;;  %958 = vmatprep.subr.bf16.mxu0 %v957_v26  ;;  %v313_v57 = vld [vmem:[%s1248_s28 + $0xd8] sm:$0xff]  ;;  %v310_v58 = vld [vmem:[%s1248_s28 + $0xc0] sm:$0xff]  ;;  %v312_v59 = vld [vmem:[%s1248_s28 + $0xd0] sm:$0xff] }
  0x52   : > { %990 = vmatprep.subr.bf16.mxu1 %v989_v29  ;;  %v315_v60 = vld [vmem:[%s1248_s28 + $0xe8] sm:$0xff]  ;;  %v317_v61 = vld [vmem:[%s1248_s28 + $0xf8] sm:$0xff]  ;;  %v314_v62 = vld [vmem:[%s1248_s28 + $0xe0] sm:$0xff] }
  0x53   : > { %v316_v63 = vld [vmem:[%s1248_s28 + $0xf0] sm:$0xff]  ;;  %v319_v0 = vld [vmem:[%s1248_s28 + $0x108] sm:$0xff]  ;;  %v321_v1 = vld [vmem:[%s1248_s28 + $0x118] sm:$0xff] }
  0x54   : > { %960 = vmatpush3.bf16.msra.mxu0 %v959_v32  ;;  %v318_v2 = vld [vmem:[%s1248_s28 + $0x100] sm:$0xff]  ;;  %v320_v3 = vld [vmem:[%s1248_s28 + $0x110] sm:$0xff]  ;;  %v323_v4 = vld [vmem:[%s1248_s28 + $0x128] sm:$0xff] }
  0x55   : > { %992 = vmatpush3.bf16.msra.mxu1 %v991_v33  ;;  %v325_v5 = vld [vmem:[%s1248_s28 + $0x138] sm:$0xff]  ;;  %v322_v6 = vld [vmem:[%s1248_s28 + $0x120] sm:$0xff]  ;;  %v324_v7 = vld [vmem:[%s1248_s28 + $0x130] sm:$0xff] }
  0x56   : > { %v327_v8 = vld [vmem:[%s1248_s28 + $0x148] sm:$0xff]  ;;  %v329_v9 = vld [vmem:[%s1248_s28 + $0x158] sm:$0xff]  ;;  %v326_v10 = vld [vmem:[%s1248_s28 + $0x140] sm:$0xff] }
  0x57   : > { %415 = vmatmul.mubr.f32.vlgmr.msra.gmra.mrb[0].mxu0 %v286_v34  ;;  %v328_v11 = vld [vmem:[%s1248_s28 + $0x150] sm:$0xff]  ;;  %v331_v12 = vld [vmem:[%s1248_s28 + $0x168] sm:$0xff]  ;;  %v333_v13 = vld [vmem:[%s1248_s28 + $0x178] sm:$0xff] }
  0x58   : > { %560 = vmatmul.mubr.f32.vlgmr.msra.gmra.mrb[0].mxu1 %v288_v35  ;;  %419 = vmatprep.mubr.f32.mxu0 %v291_v36  ;;  %v330_v14 = vld [vmem:[%s1248_s28 + $0x160] sm:$0xff]  ;;  %v332_v15 = vld [vmem:[%s1248_s28 + $0x170] sm:$0xff]  ;;  %v335_v16 = vld [vmem:[%s1248_s28 + $0x188] sm:$0xff] }
  0x59   : > { %564 = vmatprep.mubr.f32.mxu1 %v293_v37  ;;  %v337_v17 = vld [vmem:[%s1248_s28 + $0x198] sm:$0xff]  ;;  %v334_v18 = vld [vmem:[%s1248_s28 + $0x180] sm:$0xff]  ;;  %v336_v19 = vld [vmem:[%s1248_s28 + $0x190] sm:$0xff] }
  0x5a   : > { %v339_v20 = vld [vmem:[%s1248_s28 + $0x1a8] sm:$0xff]  ;;  %v341_v21 = vld [vmem:[%s1248_s28 + $0x1b8] sm:$0xff]  ;;  %v338_v22 = vld [vmem:[%s1248_s28 + $0x1a0] sm:$0xff] }
  0x5b   : > { %420 = vmatmul.mubr.f32.gmra.mrb[2].mxu0 %v290_v38  ;;  %v340_v23 = vld [vmem:[%s1248_s28 + $0x1b0] sm:$0xff]  ;;  %v343_v24 = vld [vmem:[%s1248_s28 + $0x1c8] sm:$0xff]  ;;  %v345_v25 = vld [vmem:[%s1248_s28 + $0x1d8] sm:$0xff] }
  0x5c   : > { %565 = vmatmul.mubr.f32.gmra.mrb[2].mxu1 %v292_v39  ;;  %424 = vmatprep.mubr.f32.mxu0 %v295_v40  ;;  %v342_v26 = vld [vmem:[%s1248_s28 + $0x1c0] sm:$0xff]  ;;  %v344_v27 = vld [vmem:[%s1248_s28 + $0x1d0] sm:$0xff]  ;;  %v347_v28 = vld [vmem:[%s1248_s28 + $0x1e8] sm:$0xff] }
  0x5d   : > { %569 = vmatprep.mubr.f32.mxu1 %v297_v41  ;;  %v349_v29 = vld [vmem:[%s1248_s28 + $0x1f8] sm:$0xff]  ;;  %v346_v30 = vld [vmem:[%s1248_s28 + $0x1e0] sm:$0xff]  ;;  %v348_v31 = vld [vmem:[%s1248_s28 + $0x1f0] sm:$0xff]  ;;  %s1514_s28 = scalar_lea.vmem %s1552_s2, %s764_s20 }
  0x5f   : > { %425 = vmatmul.mubr.f32.gmra.mrb[4].mxu0 %v294_v42 }
  0x60   : > { %570 = vmatmul.mubr.f32.gmra.mrb[4].mxu1 %v296_v43  ;;  %429 = vmatprep.mubr.f32.mxu0 %v299_v44 }
  0x61   : > { %574 = vmatprep.mubr.f32.mxu1 %v301_v45 }
  0x63   : > { %430 = vmatmul.mubr.f32.gmra.mrb[6].mxu0 %v298_v46 }
  0x64   : > { %575 = vmatmul.mubr.f32.gmra.mrb[6].mxu1 %v300_v47  ;;  %434 = vmatprep.mubr.f32.mxu0 %v303_v48 }
  0x65   : > { %579 = vmatprep.mubr.f32.mxu1 %v305_v49 }
  0x67   : > { %435 = vmatmul.mubr.f32.gmra.mrb[8].mxu0 %v302_v50 }
  0x68   : > { %580 = vmatmul.mubr.f32.gmra.mrb[8].mxu1 %v304_v51  ;;  %439 = vmatprep.mubr.f32.mxu0 %v307_v52 }
  0x69   : > { %584 = vmatprep.mubr.f32.mxu1 %v309_v53 }
  0x6b   : > { %440 = vmatmul.mubr.f32.gmra.mrb[10].mxu0 %v306_v54 }
  0x6c   : > { %585 = vmatmul.mubr.f32.gmra.mrb[10].mxu1 %v308_v55  ;;  %444 = vmatprep.mubr.f32.mxu0 %v311_v56 }
  0x6d   : > { %589 = vmatprep.mubr.f32.mxu1 %v313_v57 }
  0x6f   : > { %445 = vmatmul.mubr.f32.gmra.mrb[12].mxu0 %v310_v58 }
  0x70   : > { %590 = vmatmul.mubr.f32.gmra.mrb[12].mxu1 %v312_v59  ;;  %449 = vmatprep.mubr.f32.mxu0 %v315_v60 }
  0x71   : > { %594 = vmatprep.mubr.f32.mxu1 %v317_v61 }
  0x73   : > { %450 = vmatmul.mubr.f32.gmra.mrb[14].mxu0 %v314_v62 }
  0x74   : > { %595 = vmatmul.mubr.f32.gmra.mrb[14].mxu1 %v316_v63  ;;  %454 = vmatprep.mubr.f32.mxu0 %v319_v0 }
  0x75   : > { %599 = vmatprep.mubr.f32.mxu1 %v321_v1 }
  0x77   : > { %455 = vmatmul.mubr.f32.gmra.mrb[16].mxu0 %v318_v2 }
  0x78   : > { %600 = vmatmul.mubr.f32.gmra.mrb[16].mxu1 %v320_v3  ;;  %459 = vmatprep.mubr.f32.mxu0 %v323_v4 }
  0x79   : > { %604 = vmatprep.mubr.f32.mxu1 %v325_v5 }
  0x7b   : > { %460 = vmatmul.mubr.f32.gmra.mrb[18].mxu0 %v322_v6 }
  0x7c   : > { %605 = vmatmul.mubr.f32.gmra.mrb[18].mxu1 %v324_v7  ;;  %464 = vmatprep.mubr.f32.mxu0 %v327_v8 }
  0x7d   : > { %609 = vmatprep.mubr.f32.mxu1 %v329_v9 }
  0x7f   : > { %465 = vmatmul.mubr.f32.gmra.mrb[20].mxu0 %v326_v10 }
  0x80   : > { %610 = vmatmul.mubr.f32.gmra.mrb[20].mxu1 %v328_v11  ;;  %469 = vmatprep.mubr.f32.mxu0 %v331_v12 }
  0x81   : > { %614 = vmatprep.mubr.f32.mxu1 %v333_v13 }
  0x83   : > { %470 = vmatmul.mubr.f32.gmra.mrb[22].mxu0 %v330_v14 }
  0x84   : > { %615 = vmatmul.mubr.f32.gmra.mrb[22].mxu1 %v332_v15  ;;  %474 = vmatprep.mubr.f32.mxu0 %v335_v16 }
  0x85   : > { %619 = vmatprep.mubr.f32.mxu1 %v337_v17 }
  0x87   : > { %475 = vmatmul.mubr.f32.gmra.mrb[24].mxu0 %v334_v18 }
  0x88   : > { %620 = vmatmul.mubr.f32.gmra.mrb[24].mxu1 %v336_v19  ;;  %479 = vmatprep.mubr.f32.mxu0 %v339_v20 }
  0x89   : > { %624 = vmatprep.mubr.f32.mxu1 %v341_v21 }
  0x8b   : > { %480 = vmatmul.mubr.f32.gmra.mrb[26].mxu0 %v338_v22 }
  0x8c   : > { %625 = vmatmul.mubr.f32.gmra.mrb[26].mxu1 %v340_v23  ;;  %484 = vmatprep.mubr.f32.mxu0 %v343_v24 }
  0x8d   : > { %629 = vmatprep.mubr.f32.mxu1 %v345_v25 }
  0x8f   : > { %485 = vmatmul.mubr.f32.gmra.mrb[28].mxu0 %v342_v26 }
  0x90   : > { %630 = vmatmul.mubr.f32.gmra.mrb[28].mxu1 %v344_v27  ;;  %489 = vmatprep.mubr.f32.mxu0 %v347_v28 }
  0x91   : > { %634 = vmatprep.mubr.f32.mxu1 %v349_v29 }
  0x93   : > { %490 = vmatmul.mubr.f32.gmra.mrb[30].mxu0 %v346_v30 }
  0x94   : > { %635 = vmatmul.mubr.f32.gmra.mrb[30].mxu1 %v348_v31 }
 0x12a   : > { %v801_v32 = vpop.f32.mrb[0].mxu0 }
 0x12b   : > { %v881_v33 = vpop.f32.mrb[0].mxu1  ;;  %v802_v34 = vpop.f32.mrb[1].mxu0 }
 0x12c   : > { %v803_v35 = vadd.f32 %v802_v34, %v801_v32  ;;  %v882_v36 = vpop.f32.mrb[1].mxu1 }
 0x12d   : > { %v883_v37 = vadd.f32 %v882_v36, %v881_v33 }
 0x12e   : > { %v804_v38 = vpop.f32.mrb[2].mxu0 }
 0x12f   : > { %v562_v39 = vadd.f32 %v883_v37, %v803_v35  ;;  %v884_v40 = vpop.f32.mrb[2].mxu1  ;;  %v805_v41 = vpop.f32.mrb[3].mxu0 }
 0x130   : > { %v806_v42 = vadd.f32 %v805_v41, %v804_v38  ;;  %v885_v43 = vpop.f32.mrb[3].mxu1 }
 0x131   : > { %v886_v44 = vadd.f32 %v885_v43, %v884_v40  ;;  %656 = vst [vmem:[%s1514_s28] sm:$0xff] %v562_v39 }
 0x132   : > { %v807_v45 = vpop.f32.mrb[4].mxu0 }
 0x133   : > { %v567_v46 = vadd.f32 %v886_v44, %v806_v42  ;;  %v887_v47 = vpop.f32.mrb[4].mxu1  ;;  %v808_v48 = vpop.f32.mrb[5].mxu0 }
 0x134   : > { %v809_v49 = vadd.f32 %v808_v48, %v807_v45  ;;  %v888_v50 = vpop.f32.mrb[5].mxu1 }
 0x135   : > { %v889_v51 = vadd.f32 %v888_v50, %v887_v47  ;;  %657 = vst [vmem:[%s1514_s28 + $0x8] sm:$0xff] %v567_v46 }
 0x136   : > { %v810_v52 = vpop.f32.mrb[6].mxu0 }
 0x137   : > { %v572_v53 = vadd.f32 %v889_v51, %v809_v49  ;;  %v890_v54 = vpop.f32.mrb[6].mxu1  ;;  %v811_v55 = vpop.f32.mrb[7].mxu0 }
 0x138   : > { %v812_v56 = vadd.f32 %v811_v55, %v810_v52  ;;  %v891_v57 = vpop.f32.mrb[7].mxu1 }
 0x139   : > { %v892_v58 = vadd.f32 %v891_v57, %v890_v54  ;;  %658 = vst [vmem:[%s1514_s28 + $0x10] sm:$0xff] %v572_v53 }
 0x13a   : > { %v813_v59 = vpop.f32.mrb[8].mxu0 }
 0x13b   : > { %v577_v60 = vadd.f32 %v892_v58, %v812_v56  ;;  %v893_v61 = vpop.f32.mrb[8].mxu1  ;;  %v814_v62 = vpop.f32.mrb[9].mxu0 }
 0x13c   : > { %v815_v63 = vadd.f32 %v814_v62, %v813_v59  ;;  %v894_v0 = vpop.f32.mrb[9].mxu1 }
 0x13d   : > { %v895_v1 = vadd.f32 %v894_v0, %v893_v61  ;;  %659 = vst [vmem:[%s1514_s28 + $0x18] sm:$0xff] %v577_v60 }
 0x13e   : > { %v816_v2 = vpop.f32.mrb[10].mxu0 }
 0x13f   : > { %v582_v3 = vadd.f32 %v895_v1, %v815_v63  ;;  %v896_v4 = vpop.f32.mrb[10].mxu1  ;;  %v817_v5 = vpop.f32.mrb[11].mxu0 }
 0x140   : > { %v818_v6 = vadd.f32 %v817_v5, %v816_v2  ;;  %v897_v7 = vpop.f32.mrb[11].mxu1 }
 0x141   : > { %v898_v8 = vadd.f32 %v897_v7, %v896_v4  ;;  %660 = vst [vmem:[%s1514_s28 + $0x20] sm:$0xff] %v582_v3 }
 0x142   : > { %v819_v9 = vpop.f32.mrb[12].mxu0 }
 0x143   : > { %v587_v10 = vadd.f32 %v898_v8, %v818_v6  ;;  %v899_v11 = vpop.f32.mrb[12].mxu1  ;;  %v820_v12 = vpop.f32.mrb[13].mxu0 }
 0x144   : > { %v821_v13 = vadd.f32 %v820_v12, %v819_v9  ;;  %v900_v14 = vpop.f32.mrb[13].mxu1 }
 0x145   : > { %v901_v15 = vadd.f32 %v900_v14, %v899_v11  ;;  %661 = vst [vmem:[%s1514_s28 + $0x28] sm:$0xff] %v587_v10 }
 0x146   : > { %v822_v16 = vpop.f32.mrb[14].mxu0 }
 0x147   : > { %v592_v17 = vadd.f32 %v901_v15, %v821_v13  ;;  %v902_v18 = vpop.f32.mrb[14].mxu1  ;;  %v823_v19 = vpop.f32.mrb[15].mxu0 }
 0x148   : > { %v824_v20 = vadd.f32 %v823_v19, %v822_v16  ;;  %v903_v21 = vpop.f32.mrb[15].mxu1 }
 0x149   : > { %v904_v22 = vadd.f32 %v903_v21, %v902_v18  ;;  %662 = vst [vmem:[%s1514_s28 + $0x30] sm:$0xff] %v592_v17 }
 0x14a   : > { %v825_v23 = vpop.f32.mrb[16].mxu0 }
 0x14b   : > { %v597_v24 = vadd.f32 %v904_v22, %v824_v20  ;;  %v905_v25 = vpop.f32.mrb[16].mxu1  ;;  %v826_v26 = vpop.f32.mrb[17].mxu0 }
 0x14c   : > { %v827_v27 = vadd.f32 %v826_v26, %v825_v23  ;;  %v906_v28 = vpop.f32.mrb[17].mxu1 }
 0x14d   : > { %v907_v29 = vadd.f32 %v906_v28, %v905_v25  ;;  %663 = vst [vmem:[%s1514_s28 + $0x38] sm:$0xff] %v597_v24 }
 0x14e   : > { %v828_v30 = vpop.f32.mrb[18].mxu0 }
 0x14f   : > { %v602_v31 = vadd.f32 %v907_v29, %v827_v27  ;;  %v908_v32 = vpop.f32.mrb[18].mxu1  ;;  %v829_v33 = vpop.f32.mrb[19].mxu0 }
 0x150   : > { %v830_v34 = vadd.f32 %v829_v33, %v828_v30  ;;  %v909_v35 = vpop.f32.mrb[19].mxu1 }
 0x151   : > { %v910_v36 = vadd.f32 %v909_v35, %v908_v32  ;;  %664 = vst [vmem:[%s1514_s28 + $0x40] sm:$0xff] %v602_v31 }
 0x152   : > { %v831_v37 = vpop.f32.mrb[20].mxu0 }
 0x153   : > { %v607_v38 = vadd.f32 %v910_v36, %v830_v34  ;;  %v911_v39 = vpop.f32.mrb[20].mxu1  ;;  %v832_v40 = vpop.f32.mrb[21].mxu0 }
 0x154   : > { %v833_v41 = vadd.f32 %v832_v40, %v831_v37  ;;  %v912_v42 = vpop.f32.mrb[21].mxu1 }
 0x155   : > { %v913_v43 = vadd.f32 %v912_v42, %v911_v39  ;;  %665 = vst [vmem:[%s1514_s28 + $0x48] sm:$0xff] %v607_v38 }
 0x156   : > { %v834_v44 = vpop.f32.mrb[22].mxu0 }
 0x157   : > { %v612_v45 = vadd.f32 %v913_v43, %v833_v41  ;;  %v914_v46 = vpop.f32.mrb[22].mxu1  ;;  %v835_v47 = vpop.f32.mrb[23].mxu0 }
 0x158   : > { %v836_v48 = vadd.f32 %v835_v47, %v834_v44  ;;  %v915_v49 = vpop.f32.mrb[23].mxu1 }
 0x159   : > { %v916_v50 = vadd.f32 %v915_v49, %v914_v46  ;;  %666 = vst [vmem:[%s1514_s28 + $0x50] sm:$0xff] %v612_v45 }
 0x15a   : > { %v837_v51 = vpop.f32.mrb[24].mxu0 }
 0x15b   : > { %v617_v52 = vadd.f32 %v916_v50, %v836_v48  ;;  %v917_v53 = vpop.f32.mrb[24].mxu1  ;;  %v838_v54 = vpop.f32.mrb[25].mxu0 }
 0x15c   : > { %v839_v55 = vadd.f32 %v838_v54, %v837_v51  ;;  %v918_v56 = vpop.f32.mrb[25].mxu1 }
 0x15d   : > { %v919_v57 = vadd.f32 %v918_v56, %v917_v53  ;;  %667 = vst [vmem:[%s1514_s28 + $0x58] sm:$0xff] %v617_v52 }
 0x15e   : > { %v840_v58 = vpop.f32.mrb[26].mxu0 }
 0x15f   : > { %v622_v59 = vadd.f32 %v919_v57, %v839_v55  ;;  %v920_v60 = vpop.f32.mrb[26].mxu1  ;;  %v841_v61 = vpop.f32.mrb[27].mxu0 }
 0x160   : > { %v842_v62 = vadd.f32 %v841_v61, %v840_v58  ;;  %v921_v63 = vpop.f32.mrb[27].mxu1 }
 0x161   : > { %v922_v0 = vadd.f32 %v921_v63, %v920_v60  ;;  %668 = vst [vmem:[%s1514_s28 + $0x60] sm:$0xff] %v622_v59 }
 0x162   : > { %v843_v1 = vpop.f32.mrb[28].mxu0 }
 0x163   : > { %v627_v2 = vadd.f32 %v922_v0, %v842_v62  ;;  %v923_v3 = vpop.f32.mrb[28].mxu1  ;;  %v844_v4 = vpop.f32.mrb[29].mxu0 }
 0x164   : > { %v845_v5 = vadd.f32 %v844_v4, %v843_v1  ;;  %v924_v6 = vpop.f32.mrb[29].mxu1 }
 0x165   : > { %v925_v7 = vadd.f32 %v924_v6, %v923_v3  ;;  %669 = vst [vmem:[%s1514_s28 + $0x68] sm:$0xff] %v627_v2 }
 0x166   : > { %v846_v8 = vpop.f32.mrb[30].mxu0 }
 0x167   : > { %v632_v9 = vadd.f32 %v925_v7, %v845_v5  ;;  %v926_v10 = vpop.f32.mrb[30].mxu1  ;;  %v847_v11 = vpop.f32.mrb[31].mxu0 }
 0x168   : > { %v848_v12 = vadd.f32 %v847_v11, %v846_v8  ;;  %v927_v13 = vpop.f32.mrb[31].mxu1 }
 0x169   : > { %v928_v14 = vadd.f32 %v927_v13, %v926_v10  ;;  %670 = vst [vmem:[%s1514_s28 + $0x70] sm:$0xff] %v632_v9 }
 0x16b   : > { %v637_v15 = vadd.f32 %v928_v14, %v848_v12 }
 0x16d   : > { %671 = vst [vmem:[%s1514_s28 + $0x78] sm:$0xff] %v637_v15 }
 0x16e PF: > { %s15_s14 = sadd.s32 1, %s1131_s14   ;;  %s1556_s9 = smov %s1115_s10 }
 0x16f   : > { %p12_p9 = scmp.ge.s32.totalorder %s15_s14, 6   ;;  %s1557_s10 = smov %s1119_s11 }
 0x170   : > { %s1558_s11 = smov %s1200_s21  ;;  %s1559_s12 = smov %s1127_s13 }
 0x171   : > { %s1560_s13 = smov %s1562_s16  ;;  %14 = sbr.rel (!%p12_p9) target bundleno = 4 (0x4), region = 73 }
 0x178   :  { %694 = vsyncpa [#allocation3], 1 }
 0x179   :  { %696 = vsyncpa [#allocation3 + $0x1], 1 }

</bundles_post_ra>
